<compile_context>
chip_gen: v5e
topology: v5e:2x2
jax: 0.10.0
libtpu: 0.0.40
codegen_flags: <defaults>
</compile_context>

<pallas_src>
import functools

import jax
import jax.numpy as jnp
from jax import lax
from jax.experimental import pallas as pl
from jax.experimental.pallas import tpu as pltpu


_NEG_BIG = -1.0e9    # matches masked_fill(mask == 0, -1e9) in the PyTorch module
_NEG_PAD = -1.0e30   # for padded (non-existent) keys: exp underflows to exactly 0


def _round_up(x, m):
    return (x + m - 1) // m * m


def _sdpa_flash_kernel(seed_ref, q_ref, k_ref, v_ref, bias_ref, o_ref,
                       qs_ref, m_ref, l_ref, acc_ref,
                       *, scale, dropout_p, training):
    kv = pl.program_id(2)

    @pl.when(kv == 0)
    def _init():
        # Scale q once per (batch*head, q-tile) instead of once per kv step.
        qs_ref[...] = q_ref[0] * scale
        m_ref[...] = jnp.full_like(m_ref, -jnp.inf)
        l_ref[...] = jnp.zeros_like(l_ref)
        acc_ref[...] = jnp.zeros_like(acc_ref)

    q = qs_ref[...]                           # (tq, D), native dtype, pre-scaled
    k = k_ref[0]                              # (tk, D)

    # scores = (q/temperature) @ k^T, contracting last dims directly (no transpose).
    s = lax.dot_general(q, k, dimension_numbers=(((1,), (1,)), ((), ())),
                        preferred_element_type=jnp.float32)       # (tq, tk) f32

    # Exact masked_fill semantics: masked keys -> -1e9, padded keys -> -1e30.
    b = bias_ref[0]                           # (1, tk) f32, broadcast over sublanes
    s = jnp.where(b == 0.0, s, b)

    m_prev = m_ref[...]                                            # (tq, 1)
    m_new = jnp.maximum(m_prev, jnp.max(s, axis=-1, keepdims=True))
    alpha = jnp.exp(m_prev - m_new)
    p = jnp.exp(s - m_new)                                         # (tq, tk)

    # Normalizer accumulates the *un-dropped* probabilities (dropout acts post-softmax).
    l_ref[...] = alpha * l_ref[...] + jnp.sum(p, axis=-1, keepdims=True)

    if training and dropout_p > 0.0:
        # TODO(synk): training-mode dropout uses the TPU stateful PRNG, so its random
        # stream (but not its distribution / 1/(1-p) scaling) differs from torch.nn.Dropout.
        step = ((pl.program_id(0) * pl.num_programs(1) + pl.program_id(1))
                * pl.num_programs(2) + kv)
        pltpu.prng_seed(seed_ref[0] + step)
        bits = pltpu.bitcast(pltpu.prng_random_bits(p.shape), jnp.uint32)
        keep = bits >= jnp.uint32(int(dropout_p * 4294967296.0))
        p = jnp.where(keep, p, 0.0)

    acc_ref[...] = alpha * acc_ref[...] + jnp.dot(
        p.astype(v_ref.dtype), v_ref[0], preferred_element_type=jnp.float32)
    m_ref[...] = m_new

    @pl.when(kv == pl.num_programs(2) - 1)
    def _finalize():
        l = l_ref[...]
        inv_l = pl.reciprocal(l, approx=True)          # EUP slot, overlaps VALU/MXU
        inv_l = inv_l * (2.0 - l * inv_l)              # one Newton step on (tq,1): ~free
        if training and dropout_p > 0.0:
            inv_l = inv_l * (1.0 / (1.0 - dropout_p))  # fold inverted-dropout scale
        o_ref[0] = (acc_ref[...] * inv_l).astype(o_ref.dtype)


def scaled_dot_product_attention(q, k, v, mask=None, *, temperature=1.0,
                                 dropout_p=0.3, training=False, seed=0):
    B, H, Lq, D = q.shape
    _, _, Lk, Dv = v.shape

    # ---- mask "fill" values built in the wrapper (mask.unsqueeze(-2) semantics) ----
    if mask is None:
        bias = jnp.zeros((B, H, 1, Lk), jnp.float32)
    else:
        if mask.ndim == 2:                     # (B, Lk)      -> (B, 1, 1, Lk)
            mask = mask[:, None, None, :]
        elif mask.ndim == 3:                   # (B, H, Lk)   -> (B, H, 1, Lk)
            mask = mask[:, :, None, :]
        mask = jnp.broadcast_to(mask, (B, H, 1, Lk))
        bias = jnp.where(mask == 0, jnp.float32(_NEG_BIG), jnp.float32(0.0))

    # ---- tile sizes: lane/sublane aligned, bounded so VMEM fits all generations ----
    tq = min(256, _round_up(Lq, 8))
    tk = min(512, _round_up(Lk, 128))
    lq_p = _round_up(Lq, tq)
    lk_p = _round_up(Lk, tk)
    dv_p = _round_up(Dv, 128)                  # lane-dense output stores

    BH = B * H
    q3 = q.reshape(BH, Lq, D)
    k3 = k.reshape(BH, Lk, D)
    v3 = v.reshape(BH, Lk, Dv)
    bias3 = bias.reshape(BH, 1, Lk)

    if lq_p != Lq:
        q3 = jnp.pad(q3, ((0, 0), (0, lq_p - Lq), (0, 0)))
    if lk_p != Lk:
        k3 = jnp.pad(k3, ((0, 0), (0, lk_p - Lk), (0, 0)))
        v3 = jnp.pad(v3, ((0, 0), (0, lk_p - Lk), (0, 0)))
        bias3 = jnp.pad(bias3, ((0, 0), (0, 0), (0, lk_p - Lk)),
                        constant_values=_NEG_PAD)
    if dv_p != Dv:
        v3 = jnp.pad(v3, ((0, 0), (0, 0), (0, dv_p - Dv)))

    seed_arr = jnp.array([seed], dtype=jnp.int32)
    kernel = functools.partial(_sdpa_flash_kernel,
                               scale=float(1.0 / temperature),
                               dropout_p=float(dropout_p),
                               training=bool(training))

    grid = (BH, lq_p // tq, lk_p // tk)
    grid_spec = pltpu.PrefetchScalarGridSpec(
        num_scalar_prefetch=1,
        grid=grid,
        in_specs=[
            pl.BlockSpec((1, tq, D), lambda b, i, j, seed: (b, i, 0)),     # q
            pl.BlockSpec((1, tk, D), lambda b, i, j, seed: (b, j, 0)),     # k
            pl.BlockSpec((1, tk, dv_p), lambda b, i, j, seed: (b, j, 0)),  # v
            pl.BlockSpec((1, 1, tk), lambda b, i, j, seed: (b, 0, j)),     # mask fill
        ],
        out_specs=pl.BlockSpec((1, tq, dv_p), lambda b, i, j, seed: (b, i, 0)),
        scratch_shapes=[
            pltpu.VMEM((tq, D), q3.dtype),         # pre-scaled q tile
            pltpu.VMEM((tq, 1), jnp.float32),      # running max
            pltpu.VMEM((tq, 1), jnp.float32),      # running sum
            pltpu.VMEM((tq, dv_p), jnp.float32),   # output accumulator
        ],
    )

    out = pl.pallas_call(
        kernel,
        out_shape=jax.ShapeDtypeStruct((BH, lq_p, dv_p), q.dtype),
        grid_spec=grid_spec,
        compiler_params=pltpu.CompilerParams(
            dimension_semantics=("parallel", "parallel", "arbitrary"),
        ),
    )(seed_arr, q3, k3, v3, bias3)

    return out[:, :Lq, :Dv].reshape(B, H, Lq, Dv)


def _reference(q, k, v, mask, temperature):
    # Pure-JAX reference mirroring the PyTorch forward (eval mode: dropout = identity).
    scores = jnp.einsum("bhqd,bhkd->bhqk", q / temperature, k)
    scores = jnp.where(mask[:, :, None, :] == 0, -1.0e9, scores)
    attn = jax.nn.softmax(scores, axis=-1)
    return jnp.einsum("bhqk,bhkd->bhqd", attn, v)


if __name__ == "__main__":
    def run_case(B, H, Lq, Lk, D, Dv, temperature, tail, key):
        kq, kk, kv_ = jax.random.split(key, 3)
        q = jax.random.normal(kq, (B, H, Lq, D), dtype=jnp.float32)
        k = jax.random.normal(kk, (B, H, Lk, D), dtype=jnp.float32)
        v = jax.random.normal(kv_, (B, H, Lk, Dv), dtype=jnp.float32)

        # Deterministic mask: batch b keeps the first (Lk - 2*b - tail) keys.
        key_pos = jnp.arange(Lk)[None, None, :]
        valid_len = jnp.maximum(Lk - 2 * jnp.arange(B) - tail, 1)[:, None, None]
        mask = (key_pos < valid_len).astype(jnp.int32)          # (B, 1, Lk)
        mask = jnp.broadcast_to(mask, (B, H, Lk))               # (B, H, Lk)

        out = scaled_dot_product_attention(q, k, v, mask, temperature=temperature,
                                           dropout_p=0.3, training=False)
        out = jax.block_until_ready(out)

        ref = _reference(q, k, v, mask, temperature)
        assert out.shape == (B, H, Lq, Dv)
        assert jnp.allclose(out, ref, atol=1e-4, rtol=1e-4), "mismatch vs reference"

    key = jax.random.PRNGKey(0)
    k1, k2 = jax.random.split(key)
    # Small module-consistent shapes (B=2, H=4, seq=8, head dim=32).
    run_case(2, 4, 8, 8, 32, 32, 2.0, 0, k1)
    # Longer Lk exercises the multi kv-tile accumulator + Dv/Lk padding paths.
    run_case(1, 2, 40, 640, 32, 48, 1.5, 5, k2)

    print("KERNEL_OK")
</pallas_src>

<mosaic_0001>
module attributes {stable_mosaic.version = 11 : i64} {
  func.func @_sdpa_flash_kernel(%arg0: i32, %arg1: i32, %arg2: i32, %arg3: memref<1xi32, #tpu.memory_space<smem>>, %arg4: memref<1x8x32xf32, #tpu.memory_space<vmem>>, %arg5: memref<1x128x32xf32, #tpu.memory_space<vmem>>, %arg6: memref<1x128x128xf32, #tpu.memory_space<vmem>>, %arg7: memref<1x1x128xf32, #tpu.memory_space<vmem>>, %arg8: memref<1x8x128xf32, #tpu.memory_space<vmem>>, %arg9: memref<8x32xf32, #tpu.memory_space<vmem>>, %arg10: memref<8x1xf32, #tpu.memory_space<vmem>>, %arg11: memref<8x1xf32, #tpu.memory_space<vmem>>, %arg12: memref<8x128xf32, #tpu.memory_space<vmem>>) attributes {dimension_semantics = [#tpu.dimension_semantics<parallel>, #tpu.dimension_semantics<parallel>, #tpu.dimension_semantics<arbitrary>], iteration_bounds = array<i64: 8, 1, 1>, scalar_prefetch = 1 : i64, scratch_operands = 4 : i64, tpu.core_type = #tpu.core_type<tc>, window_params = [{transform_indices = @transform_0, window_bounds = array<i64: 1, 8, 32>}, {transform_indices = @transform_1, window_bounds = array<i64: 1, 128, 32>}, {transform_indices = @transform_2, window_bounds = array<i64: 1, 128, 128>}, {transform_indices = @transform_3, window_bounds = array<i64: 1, 1, 128>}, {transform_indices = @transform_4, window_bounds = array<i64: 1, 8, 128>}]} {
    %c0_i32 = arith.constant 0 : i32
    %0 = arith.cmpi eq, %arg2, %c0_i32 : i32
    %1 = arith.extui %0 : i1 to i32
    %c0_i32_0 = arith.constant 0 : i32
    %2 = arith.cmpi ne, %1, %c0_i32_0 : i32
    scf.if %2 {
      %c0_29 = arith.constant 0 : index
      %c0_30 = arith.constant 0 : index
      %c0_31 = arith.constant 0 : index
      %43 = vector.load %arg4[%c0_29, %c0_30, %c0_31] : memref<1x8x32xf32, #tpu.memory_space<vmem>>, vector<1x8x32xf32>
      %44 = vector.shape_cast %43 : vector<1x8x32xf32> to vector<8x32xf32>
      %cst_32 = arith.constant 5.000000e-01 : f32
      %45 = vector.broadcast %cst_32 : f32 to vector<8x32xf32>
      %46 = arith.mulf %44, %45 : vector<8x32xf32>
      %c0_33 = arith.constant 0 : index
      %c0_34 = arith.constant 0 : index
      %47 = vector.load %arg9[%c0_33, %c0_34] : memref<8x32xf32, #tpu.memory_space<vmem>>, vector<8x32xf32>
      tpu.vector_store %arg9[%c0_33, %c0_34], %46 {strides = array<i32>} : memref<8x32xf32, #tpu.memory_space<vmem>>, vector<8x32xf32>,
      %cst_35 = arith.constant 0xFF800000 : f32
      %48 = vector.broadcast %cst_35 : f32 to vector<8x1xf32>
      %c0_36 = arith.constant 0 : index
      %c0_37 = arith.constant 0 : index
      %49 = vector.load %arg10[%c0_36, %c0_37] : memref<8x1xf32, #tpu.memory_space<vmem>>, vector<8x1xf32>
      tpu.vector_store %arg10[%c0_36, %c0_37], %48 {strides = array<i32>} : memref<8x1xf32, #tpu.memory_space<vmem>>, vector<8x1xf32>,
      %cst_38 = arith.constant 0.000000e+00 : f32
      %50 = vector.broadcast %cst_38 : f32 to vector<8x1xf32>
      %c0_39 = arith.constant 0 : index
      %c0_40 = arith.constant 0 : index
      %51 = vector.load %arg11[%c0_39, %c0_40] : memref<8x1xf32, #tpu.memory_space<vmem>>, vector<8x1xf32>
      tpu.vector_store %arg11[%c0_39, %c0_40], %50 {strides = array<i32>} : memref<8x1xf32, #tpu.memory_space<vmem>>, vector<8x1xf32>,
      %cst_41 = arith.constant 0.000000e+00 : f32
      %52 = vector.broadcast %cst_41 : f32 to vector<8x128xf32>
      %c0_42 = arith.constant 0 : index
      %c0_43 = arith.constant 0 : index
      %53 = vector.load %arg12[%c0_42, %c0_43] : memref<8x128xf32, #tpu.memory_space<vmem>>, vector<8x128xf32>
      tpu.vector_store %arg12[%c0_42, %c0_43], %52 {strides = array<i32>} : memref<8x128xf32, #tpu.memory_space<vmem>>, vector<8x128xf32>,
    } else {
    }
    %c0 = arith.constant 0 : index
    %c0_1 = arith.constant 0 : index
    %3 = vector.load %arg9[%c0, %c0_1] : memref<8x32xf32, #tpu.memory_space<vmem>>, vector<8x32xf32>
    %c0_2 = arith.constant 0 : index
    %c0_3 = arith.constant 0 : index
    %c0_4 = arith.constant 0 : index
    %4 = vector.load %arg5[%c0_2, %c0_3, %c0_4] : memref<1x128x32xf32, #tpu.memory_space<vmem>>, vector<1x128x32xf32>
    %5 = vector.shape_cast %4 : vector<1x128x32xf32> to vector<128x32xf32>
    %cst = arith.constant dense<0.000000e+00> : vector<8x128xf32>
    %6 = tpu.matmul %3, %5, %cst {dimension_numbers = #tpu.dot_dimension_numbers<[1], [1], [0], [0], [0, 0, 1, 0], [], []>} : vector<8x32xf32>, vector<128x32xf32>, vector<8x128xf32> -> vector<8x128xf32>
    %c0_5 = arith.constant 0 : index
    %c0_6 = arith.constant 0 : index
    %c0_7 = arith.constant 0 : index
    %7 = vector.load %arg7[%c0_5, %c0_6, %c0_7] : memref<1x1x128xf32, #tpu.memory_space<vmem>>, vector<1x1x128xf32>
    %8 = vector.shape_cast %7 : vector<1x1x128xf32> to vector<1x128xf32>
    %cst_8 = arith.constant 0.000000e+00 : f32
    %9 = vector.broadcast %cst_8 : f32 to vector<1x128xf32>
    %10 = arith.cmpf oeq, %8, %9 : vector<1x128xf32>
    %11 = vector.shape_cast %10 : vector<1x128xi1> to vector<1x128xi1>
    %12 = vector.broadcast %11 : vector<1x128xi1> to vector<8x128xi1>
    %13 = vector.shape_cast %8 : vector<1x128xf32> to vector<1x128xf32>
    %14 = vector.broadcast %13 : vector<1x128xf32> to vector<8x128xf32>
    %15 = arith.select %12, %6, %14 : vector<8x128xi1>, vector<8x128xf32>
    %c0_9 = arith.constant 0 : index
    %c0_10 = arith.constant 0 : index
    %16 = vector.load %arg10[%c0_9, %c0_10] : memref<8x1xf32, #tpu.memory_space<vmem>>, vector<8x1xf32>
    %cst_11 = arith.constant dense<0xFF800000> : vector<8xf32>
    %17 = vector.multi_reduction <maximumf>, %15, %cst_11 [1] : vector<8x128xf32> to vector<8xf32>
    %18 = vector.shape_cast %17 : vector<8xf32> to vector<8x1xf32>
    %19 = arith.maximumf %16, %18 : vector<8x1xf32>
    %20 = arith.subf %16, %19 : vector<8x1xf32>
    %21 = math.exp %20 : vector<8x1xf32>
    %22 = vector.broadcast %19 : vector<8x1xf32> to vector<8x128xf32>
    %23 = arith.subf %15, %22 : vector<8x128xf32>
    %24 = math.exp %23 : vector<8x128xf32>
    %c0_12 = arith.constant 0 : index
    %c0_13 = arith.constant 0 : index
    %25 = vector.load %arg11[%c0_12, %c0_13] : memref<8x1xf32, #tpu.memory_space<vmem>>, vector<8x1xf32>
    %26 = arith.mulf %21, %25 : vector<8x1xf32>
    %cst_14 = arith.constant dense<0.000000e+00> : vector<8xf32>
    %27 = vector.multi_reduction <add>, %24, %cst_14 [1] : vector<8x128xf32> to vector<8xf32>
    %28 = vector.shape_cast %27 : vector<8xf32> to vector<8x1xf32>
    %29 = arith.addf %26, %28 : vector<8x1xf32>
    %c0_15 = arith.constant 0 : index
    %c0_16 = arith.constant 0 : index
    %30 = vector.load %arg11[%c0_15, %c0_16] : memref<8x1xf32, #tpu.memory_space<vmem>>, vector<8x1xf32>
    tpu.vector_store %arg11[%c0_15, %c0_16], %29 {strides = array<i32>} : memref<8x1xf32, #tpu.memory_space<vmem>>, vector<8x1xf32>,
    %c0_17 = arith.constant 0 : index
    %c0_18 = arith.constant 0 : index
    %31 = vector.load %arg12[%c0_17, %c0_18] : memref<8x128xf32, #tpu.memory_space<vmem>>, vector<8x128xf32>
    %32 = vector.broadcast %21 : vector<8x1xf32> to vector<8x128xf32>
    %33 = arith.mulf %32, %31 : vector<8x128xf32>
    %c0_19 = arith.constant 0 : index
    %c0_20 = arith.constant 0 : index
    %c0_21 = arith.constant 0 : index
    %34 = vector.load %arg6[%c0_19, %c0_20, %c0_21] : memref<1x128x128xf32, #tpu.memory_space<vmem>>, vector<1x128x128xf32>
    %35 = vector.shape_cast %34 : vector<1x128x128xf32> to vector<128x128xf32>
    %cst_22 = arith.constant dense<0.000000e+00> : vector<8x128xf32>
    %36 = tpu.matmul %24, %35, %cst_22 {dimension_numbers = #tpu.dot_dimension_numbers<[1], [0], [0], [1], [0, 0, 1, 1], [], []>} : vector<8x128xf32>, vector<128x128xf32>, vector<8x128xf32> -> vector<8x128xf32>
    %37 = arith.addf %33, %36 : vector<8x128xf32>
    %c0_23 = arith.constant 0 : index
    %c0_24 = arith.constant 0 : index
    %38 = vector.load %arg12[%c0_23, %c0_24] : memref<8x128xf32, #tpu.memory_space<vmem>>, vector<8x128xf32>
    tpu.vector_store %arg12[%c0_23, %c0_24], %37 {strides = array<i32>} : memref<8x128xf32, #tpu.memory_space<vmem>>, vector<8x128xf32>,
    %c0_25 = arith.constant 0 : index
    %c0_26 = arith.constant 0 : index
    %39 = vector.load %arg10[%c0_25, %c0_26] : memref<8x1xf32, #tpu.memory_space<vmem>>, vector<8x1xf32>
    tpu.vector_store %arg10[%c0_25, %c0_26], %19 {strides = array<i32>} : memref<8x1xf32, #tpu.memory_space<vmem>>, vector<8x1xf32>,
    %c0_i32_27 = arith.constant 0 : i32
    %40 = arith.cmpi eq, %arg2, %c0_i32_27 : i32
    %41 = arith.extui %40 : i1 to i32
    %c0_i32_28 = arith.constant 0 : i32
    %42 = arith.cmpi ne, %41, %c0_i32_28 : i32
    scf.if %42 {
      %c0_29 = arith.constant 0 : index
      %c0_30 = arith.constant 0 : index
      %43 = vector.load %arg11[%c0_29, %c0_30] : memref<8x1xf32, #tpu.memory_space<vmem>>, vector<8x1xf32>
      %44 = tpu.reciprocal %43 {approx = true} : vector<8x1xf32> -> vector<8x1xf32>
      %45 = arith.mulf %43, %44 : vector<8x1xf32>
      %cst_31 = arith.constant 2.000000e+00 : f32
      %46 = vector.broadcast %cst_31 : f32 to vector<8x1xf32>
      %47 = arith.subf %46, %45 : vector<8x1xf32>
      %48 = arith.mulf %44, %47 : vector<8x1xf32>
      %c0_32 = arith.constant 0 : index
      %c0_33 = arith.constant 0 : index
      %49 = vector.load %arg12[%c0_32, %c0_33] : memref<8x128xf32, #tpu.memory_space<vmem>>, vector<8x128xf32>
      %50 = vector.broadcast %48 : vector<8x1xf32> to vector<8x128xf32>
      %51 = arith.mulf %49, %50 : vector<8x128xf32>
      %c0_34 = arith.constant 0 : index
      %c0_35 = arith.constant 0 : index
      %c0_36 = arith.constant 0 : index
      %52 = vector.load %arg8[%c0_34, %c0_35, %c0_36] : memref<1x8x128xf32, #tpu.memory_space<vmem>>, vector<1x8x128xf32>
      %53 = vector.shape_cast %52 : vector<1x8x128xf32> to vector<8x128xf32>
      %54 = vector.shape_cast %51 : vector<8x128xf32> to vector<1x8x128xf32>
      tpu.vector_store %arg8[%c0_34, %c0_35, %c0_36], %54 {strides = array<i32>} : memref<1x8x128xf32, #tpu.memory_space<vmem>>, vector<1x8x128xf32>,
    } else {
    }
    return
  }
  func.func @transform_0(%arg0: i32, %arg1: i32, %arg2: i32, %arg3: memref<1xi32, #tpu.memory_space<smem>>) -> (i32, i32, i32) {
    %c0_i32 = arith.constant 0 : i32
    %c0_i32_0 = arith.constant 0 : i32
    return %arg0, %arg1, %c0_i32 : i32, i32, i32
  }
  func.func @transform_1(%arg0: i32, %arg1: i32, %arg2: i32, %arg3: memref<1xi32, #tpu.memory_space<smem>>) -> (i32, i32, i32) {
    %c0_i32 = arith.constant 0 : i32
    %c0_i32_0 = arith.constant 0 : i32
    return %arg0, %arg2, %c0_i32 : i32, i32, i32
  }
  func.func @transform_2(%arg0: i32, %arg1: i32, %arg2: i32, %arg3: memref<1xi32, #tpu.memory_space<smem>>) -> (i32, i32, i32) {
    %c0_i32 = arith.constant 0 : i32
    %c0_i32_0 = arith.constant 0 : i32
    return %arg0, %arg2, %c0_i32 : i32, i32, i32
  }
  func.func @transform_3(%arg0: i32, %arg1: i32, %arg2: i32, %arg3: memref<1xi32, #tpu.memory_space<smem>>) -> (i32, i32, i32) {
    %c0_i32 = arith.constant 0 : i32
    %c0_i32_0 = arith.constant 0 : i32
    return %arg0, %c0_i32, %arg2 : i32, i32, i32
  }
  func.func @transform_4(%arg0: i32, %arg1: i32, %arg2: i32, %arg3: memref<1xi32, #tpu.memory_space<smem>>) -> (i32, i32, i32) {
    %c0_i32 = arith.constant 0 : i32
    %c0_i32_0 = arith.constant 0 : i32
    return %arg0, %arg1, %c0_i32 : i32, i32, i32
  }
}

</mosaic_0001>

<bundles_post_ra>
// kernel: tpu_custom_call.1
= control target key start
LH: loop header
LB: loop body
LE: loop exit
PB: predicated region body
PF: predicated region fallthrough
CT: control target
= control target key end

     0   :  { %11 = vsyncpa [#allocation9], 0  ;;  %s1045_s0 = inlined_call_operand.<no memory space> [shape: s32[1], index: 0, kind: input, shape index: {}]   ;;  %s1046_s1 = inlined_call_operand.vmem [shape: f32[8,8,32], index: 1, kind: input, shape index: {}]   ;;  %s1047_s2 = inlined_call_operand.vmem [shape: f32[8,128,32], index: 2, kind: input, shape index: {}]   ;;  %s1048_s3 = inlined_call_operand.vmem [shape: f32[8,128,128], index: 3, kind: input, shape index: {}]   ;;  %s1049_s4 = inlined_call_operand.vmem [shape: f32[8,1,128], index: 4, kind: input, shape index: {}]   ;;  %s1050_s5 = inlined_call_operand.hbm [shape: f32[8,8,128], index: 5, kind: output, shape index: {}]  }
   0x1   :  { %13 = vsyncpa [#allocation9 + $0x1], 0  ;;  %s872_s18 = smov 0   ;;  %s874_s0 = smov 0  }
   0x2   :  { %s876_s19 = smov 0   ;;  %s878_s20 = smov 0  }
   0x3   :  { %s880_s21 = smov 0   ;;  %s882_s22 = smov 0  }
   0x4 LB: > { %s657_s23 = sadd.s32 4294967295, %s837_s22   ;;  %s658_s24 = sadd.s32 4294967294, %s837_s22   ;;  %s837_s22 = sphi %s882_s22, %s19_s22   ;;  %s833_s21 = sphi %s880_s21, %s1057_s21   ;;  %s829_s20 = sphi %s878_s20, %s1056_s20   ;;  %s825_s19 = sphi %s876_s19, %s1055_s19   ;;  %s821_s0 = sphi %s874_s0, %s1054_s0   ;;  %s817_s18 = sphi %s872_s18, %s1053_s18  }
   0x5   : > { %s38_s25 = sadd.s32 1, %s833_s21  ;;  %s159_s26 = sadd.s32 1, %s825_s19 }
   0x6   : > { %p40_p0 = scmp.ge.s32.totalorder %s38_s25, 8  ;;  %p169_p1 = scmp.ne.s32.totalorder %s825_s19, %s821_s0 }
   0x7   : > { %p170_p2 = scmp.eq.s32.totalorder %s657_s23, 7  ;;  %p175_p3 = scmp.ne.s32.totalorder %s821_s0, %s817_s18 }
   0x8   : > { %s1059_s25 = smov (%p40_p0, %s38_s25), 0  ;;  %p176_p5 = scmp.eq.s32.totalorder %s658_s24, 7 }
   0x9   : > { %p912_p4 = por %p170_p2, %p169_p1  ;;  %s154_s28 = ssub.s32 %s833_s21, %s1059_s25 }
   0xa   : > { %p661_p6 = scmp.ge.s32.totalorder %s837_s22, 1  ;;  %p157_p7 = scmp.eq.s32.totalorder %s154_s28, 0 }
   0xb   : > { %p919_p8 = por %p176_p5, %p175_p3  ;;  %p239_p9 = scmp.lt.s32.totalorder %s837_s22, 9 }
   0xc   : > { %s925_s30 = scalar_select %p157_p7, %s825_s19, %s159_s26  }
   0xd   : > { %p240_p10 = pnand %p661_p6, %p239_p9 }
   0xe   : > { %p291_p11 = scmp.lt.s32.totalorder (!%p240_p10), %s829_s20, 7  ;;  %s288_s28 = sand.u32 (!%p240_p10), 1, %s821_s0  }
   0xf   : > { %243 = sbr.rel (%p240_p10) target bundleno = 694 (0x2b6), region = 36  ;;  %s779_s23 = scalar_lea.hbm (!%p240_p10), %s1050_s5, 64 }
  0x14   : > { %s929_s6 = scalar_select %p291_p11, %s829_s20, 7  ;;  %vm330_vm0 = vcmask 261120   ;;  %v839_v19 = vmov 0   ;;  %vm332_vm1 = vcmask 7168   ;;  %v840_v20 = vmov -inf  }
  0x15   : > { %749 = vset.pattern.permute.xlu0 %v839_v19  ;;  %750 = vset.pattern.permute.xlu1 %v839_v19  ;;  %333 = vst.msk [vmem:[#allocation3] sm:$0xff] %vm332_vm1, %v840_v20  ;;  %v841_v27 = vmov 0.0  }
  0x16   : > { %s689_s7 = sshll.u32 %s929_s6, 7  ;;  %s663_s11 = sshll.u32 %s929_s6, 3  ;;  %751 = vset.pattern.permute.xlu2 %v839_v19  ;;  %334 = vst.msk [vmem:[#allocation4] sm:$0xff] %vm332_vm1, %v841_v27 }
  0x17   : > { %s937_s10 = scalar_lea.vmem %s1047_s2, %s689_s7  ;;  %s297_s14 = scalar_lea.vmem %s1046_s1, %s663_s11 }
  0x18   : > { %v352_v0 = vld [vmem:[%s937_s10 + $0x78] sm:$0xff]  ;;  %v351_v1 = vld [vmem:[%s937_s10 + $0x70] sm:$0xff]  ;;  %v350_v2 = vld [vmem:[%s937_s10 + $0x68] sm:$0xff]  ;;  %s323_s17 = scalar_lea.vmem %s1049_s4, %s929_s6  ;;  %s987_s26 = scalar_lea.vmem %s1048_s3, %s689_s7 }
  0x19   : > { %668 = vmatpush.xpose.msk.msra.mxu0 %vm330_vm0, %v352_v0  ;;  %v349_v3 = vld [vmem:[%s937_s10 + $0x60] sm:$0xff]  ;;  %v348_v4 = vld [vmem:[%s937_s10 + $0x58] sm:$0xff]  ;;  %v347_v5 = vld [vmem:[%s937_s10 + $0x50] sm:$0xff]  ;;  %s662_s6 = sshll.u32 %s288_s28, 3  ;;  %s686_s7 = sshll.u32 %s829_s20, 3 }
  0x1a   : > { %v328_v6 = vld [vmem:[%s297_s14] sm:$0xff]  ;;  %v346_v7 = vld [vmem:[%s937_s10 + $0x48] sm:$0xff]  ;;  %v344_v10 = vld [vmem:[%s937_s10 + $0x38] sm:$0xff]  ;;  %s290_s11 = scalar_lea.vmem [#allocation8], %s662_s6  ;;  %s519_s14 = scalar_lea.sflag [#allocation9], %s288_s28 }
  0x1b   : > { %v329_v8 = vmul.f32 0.5, %v328_v6  ;;  %v345_v9 = vld [vmem:[%s937_s10 + $0x40] sm:$0xff]  ;;  %v343_v11 = vld [vmem:[%s937_s10 + $0x30] sm:$0xff]  ;;  %v342_v12 = vld [vmem:[%s937_s10 + $0x28] sm:$0xff]  ;;  %s532_s12 = sshll.u32 %s290_s11, 4  ;;  %s533_s12 = int_to_ptr.vmem [resolvable:$true] %s532_s12 }
  0x1c   : > { %v341_v13 = vld [vmem:[%s937_s10 + $0x20] sm:$0xff]  ;;  %v340_v14 = vld [vmem:[%s937_s10 + $0x18] sm:$0xff]  ;;  %v339_v15 = vld [vmem:[%s937_s10 + $0x10] sm:$0xff] }
  0x1d   : > { %669 = vmatpush.xpose.msk.msra.mxu0 %vm330_vm0, %v351_v1  ;;  %331 = vst.msk [vmem:[#allocation2] sm:$0xff] %vm330_vm0, %v329_v8  ;;  %v338_v16 = vld [vmem:[%s937_s10 + $0x8] sm:$0xff]  ;;  %v337_v17 = vld [vmem:[%s937_s10] sm:$0xff]  ;;  %v478_v28 = vld [vmem:[%s987_s26 + $0x78] sm:$0xff]  ;;  %s530_s10 = scalar_lea.hbm %s1050_s5, %s686_s7 }
  0x1e   : > { %v425_v21 = vld [vmem:[%s323_s17] sm:$0x1]  ;;  %v477_v29 = vld [vmem:[%s987_s26 + $0x70] sm:$0xff]  ;;  %479 = vmatpush.msra.mxu1 %v478_v28  ;;  %v476_v30 = vld [vmem:[%s987_s26 + $0x68] sm:$0xff]  ;;  %s534_s13 = sshll.u32 %s530_s10, 4  ;;  %s535_s13 = int_to_ptr.hbm [resolvable:$true] %s534_s13 }
  0x1f   : > { %vm426_vm2 = vcmp.eq.f32.partialorder %v425_v21, 0.0  ;;  %v752_v24 = vld [vmem:[%s323_s17] ss:$0 sm:$0xff]  ;;  %v474_v32 = vld [vmem:[%s987_s26 + $0x58] sm:$0xff]  ;;  %v473_v33 = vld [vmem:[%s987_s26 + $0x50] sm:$0xff]  ;;  %s773_s15 = sshra.s32 %s535_s13, 4  ;;  %s774_s15 = int_to_ptr.hbm [resolvable:$true] %s773_s15 }
  0x20   : > { %v427_v22 = vsel %vm426_vm2, 1, %v839_v19  ;;  %480 = vmatpush.msra.mxu1 %v477_v29  ;;  %v475_v31 = vld [vmem:[%s987_s26 + $0x60] sm:$0xff]  ;;  %v472_v34 = vld [vmem:[%s987_s26 + $0x48] sm:$0xff]  ;;  %v470_v36 = vld [vmem:[%s987_s26 + $0x38] sm:$0xff]  ;;  %s775_s20 = scalar_lea.hbm %s774_s15, 8  ;;  %p780_p1 = scmp.lt.s32.totalorder %s774_s15, %s1050_s5 }
  0x21   : > { %670 = vmatpush.xpose.msk.msra.mxu0 %vm330_vm0, %v350_v2  ;;  %v428_v23 = vperm.slane %v427_v22, 0  ;;  %v471_v35 = vld [vmem:[%s987_s26 + $0x40] sm:$0xff]  ;;  %v469_v37 = vld [vmem:[%s987_s26 + $0x30] sm:$0xff]  ;;  %v434_v38 = vld [vmem:[#allocation3] sm:$0xff]  ;;  %p776_p12 = scmp.ne.s32.totalorder %s774_s15, %s775_s20  ;;  %p781_p2 = scmp.lt.s32.totalorder %s779_s23, %s775_s20 }
  0x22   : > { %481 = vmatpush.msra.mxu1 %v476_v30  ;;  %v468_v42 = vld [vmem:[%s987_s26 + $0x28] sm:$0xff]  ;;  %v467_v43 = vld [vmem:[%s987_s26 + $0x20] sm:$0xff]  ;;  %v466_v44 = vld [vmem:[%s987_s26 + $0x18] sm:$0xff] }
  0x23   : > { %vm429_vm3 = vcmp.eq.s32.totalorder %v428_v23, 1  ;;  %v465_v45 = vld [vmem:[%s987_s26 + $0x10] sm:$0xff]  ;;  %v464_v46 = vld [vmem:[%s987_s26 + $0x8] sm:$0xff]  ;;  %v463_v47 = vld [vmem:[%s987_s26] sm:$0xff]  ;;  %p777_p13 = pnand %p776_p12, %p912_p4  ;;  %p782_p3 = por %p781_p2, %p780_p1 }
  0x24   : > { %v336_v18 = vld [vmem:[#allocation2] sm:$0xff]  ;;  %482 = vmatpush.msra.mxu1 %v475_v31  ;;  %v449_v54 = vld [vmem:[#allocation4] sm:$0xff] }
  0x25   : > { %671 = vmatpush.xpose.msk.msra.mxu0 %vm330_vm0, %v349_v3  ;;  %p778_p0 = pneg %p777_p13 }
  0x26   : > { %483 = vmatpush.msra.mxu1 %v474_v32 }
  0x27   : > { %p783_p5 = pnand %p782_p3, %p778_p0 }
  0x28   : > { %484 = vmatpush.msra.mxu1 %v473_v33 }
  0x29   : > { %672 = vmatpush.xpose.msk.msra.mxu0 %vm330_vm0, %v348_v4 }
  0x2a   : > { %485 = vmatpush.msra.mxu1 %v472_v34 }
  0x2c   : > { %486 = vmatpush.msra.mxu1 %v471_v35 }
  0x2d   : > { %673 = vmatpush.xpose.msk.msra.mxu0 %vm330_vm0, %v347_v5 }
  0x2e   : > { %487 = vmatpush.msra.mxu1 %v470_v36 }
  0x30   : > { %488 = vmatpush.msra.mxu1 %v469_v37 }
  0x31   : > { %674 = vmatpush.xpose.msk.msra.mxu0 %vm330_vm0, %v346_v7 }
  0x32   : > { %489 = vmatpush.msra.mxu1 %v468_v42 }
  0x34   : > { %490 = vmatpush.msra.mxu1 %v467_v43 }
  0x35   : > { %675 = vmatpush.xpose.msk.msra.mxu0 %vm330_vm0, %v345_v9 }
  0x36   : > { %491 = vmatpush.msra.mxu1 %v466_v44 }
  0x38   : > { %492 = vmatpush.msra.mxu1 %v465_v45 }
  0x39   : > { %676 = vmatpush.xpose.msk.msra.mxu0 %vm330_vm0, %v344_v10 }
  0x3a   : > { %493 = vmatpush.msra.mxu1 %v464_v46 }
  0x3c   : > { %494 = vmatpush.msra.mxu1 %v463_v47 }
  0x3d   : > { %677 = vmatpush.xpose.msk.msra.mxu0 %vm330_vm0, %v343_v11 }
  0x41   : > { %678 = vmatpush.xpose.msk.msra.mxu0 %vm330_vm0, %v342_v12 }
  0x45   : > { %679 = vmatpush.xpose.msk.msra.mxu0 %vm330_vm0, %v341_v13 }
  0x49   : > { %680 = vmatpush.xpose.msk.msra.mxu0 %vm330_vm0, %v340_v14 }
  0x4d   : > { %681 = vmatpush.xpose.msk.msra.mxu0 %vm330_vm0, %v339_v15 }
  0x51   : > { %682 = vmatpush.xpose.msk.msra.mxu0 %vm330_vm0, %v338_v16 }
  0x55   : > { %683 = vmatpush.xpose.msk.msra.mxu0 %vm330_vm0, %v337_v17 }
  0x58   : > { %684 = vmatmul.msk.f32.vlgmr.msra.gmra.mxu0 %vm330_vm0, %v336_v18 }
  0xd5   : > { %v422_v25 = vpop.f32.mrf.mxu0 }
  0xd6   : > { %v433_v26 = vsel %vm429_vm3, %v422_v25, %v752_v24 }
  0xd7   : > { %435 = vmax.xlane.f32.xlu0 %v433_v26 }
 0x14a   : > { %v436_v39 = vpop.xlane.xlu0 %435 }
 0x14b   : > { %v437_v40 = vmax.f32 %v434_v38, %v436_v39 }
 0x14d   : > { %v438_v41 = vsub.f32 %v434_v38, %v437_v40  ;;  %501 = vst.msk [vmem:[#allocation3] sm:$0xff] %vm332_vm1, %v437_v40  ;;  %443 = vperm.xlu0 %749, %v437_v40  }
 0x14f   : > { %v439_v52 = vmul.f32 1.442695, %v438_v41 }
 0x1bf   : > { %v444_v48 = vpop.permute.xlu0 %443 }
 0x1c0   : > { %v446_v49 = vsub.f32 %v433_v26, %v444_v48 }
 0x1c2   : > { %v447_v50 = vmul.f32 1.442695, %v446_v49 }
 0x1c4   : > { %753 = vpow2.f32 %v447_v50 }
 0x1c5   : > { %755 = vpow2.f32 %v439_v52 }
 0x1ca   : > { %v754_v51 = vpop.eup %753 }
 0x1cb   : > { %451 = vadd.xlane.f32.xlu1 %v754_v51  ;;  %495 = vmatmul.f32.vlgmr.msra.gmra.mxu1 %v754_v51  ;;  %v756_v53 = vpop.eup %755 }
 0x1cc   : > { %v450_v55 = vmul.f32 %v756_v53, %v449_v54 }
 0x1e4   : > { %459 = vperm.xlu1 %750, %v756_v53  }
 0x23e   : > { %v452_v56 = vpop.xlane.xlu1 %451 }
 0x23f   : > { %v453_v57 = vadd.f32 %v452_v56, %v450_v55 }
 0x241   : > { %455 = vst.msk [vmem:[#allocation4] sm:$0xff] %vm332_vm1, %v453_v57 }
 0x248   : > { %v505_v58 = vld [vmem:[#allocation4] sm:$0xff]  ;;  %v496_v1 = vpop.f32.mrf.mxu1 }
 0x249   : > { %757 = vrcp.f32 %v505_v58 }
 0x24f   : > { %v758_v59 = vpop.eup %757 }
 0x250   : > { %v507_v60 = vmul.f32 %v758_v59, %v505_v58 }
 0x252   : > { %v508_v61 = vsub.f32 2.0, %v507_v60 }
 0x254   : > { %v509_v62 = vmul.f32 %v758_v59, %v508_v61 }
 0x256   : > { %513 = vperm.xlu2 %751, %v509_v62   ;;  %v460_v63 = vpop.permute.xlu1 %459 }
 0x257   : > { %v462_v0 = vmul.f32 0.0, %v460_v63 }
 0x259   : > { %v499_v2 = vadd.f32 %v496_v1, %v462_v0 }
 0x2b0   : > { %v514_v3 = vpop.permute.xlu2 %513 }
 0x2b1   : > { %v516_v4 = vmul.f32 %v514_v3, %v499_v2 }
 0x2b3   : > { %517 = vst [vmem:[%s290_s11] sm:$0xff] %v516_v4 }
 0x2b4   : > { %786 = shalt.err (!%p783_p5)
}
 0x2b5   : > { %691 = dma.vmem_to_hbm [thread:$0]  (%p912_p4), %s533_s12, 128, %s535_s13, %s519_s14  }
 0x2b6 PF: > { %p697_p6 = scmp.ge.s32.totalorder %s837_s22, 2  ;;  %s546_s28 = sand.u32 1, %s817_s18  }
 0x2b7   : > { %s547_s6 = scalar_lea.sflag [#allocation9], %s546_s28 }
 0x2b8   : > { %p694_p7 = pnand %p697_p6, %p919_p8 }
 0x2ba   : > { %p695_p9 = pneg %p694_p7 }
 0x2bc   : > { %812 = dma.done.wait (%p695_p9), %s547_s6, 128  }
 0x2bd   : > { %814 = vsyncadd (%p695_p9), %s547_s6, 4294967168  ;;  %s19_s22 = sadd.s32 1, %s837_s22   ;;  %s1053_s18 = smov %s821_s0 }
 0x2be   : > { %p16_p10 = scmp.ge.s32.totalorder %s19_s22, 10   ;;  %s1054_s0 = smov %s825_s19 }
 0x2bf   : > { %s1055_s19 = smov %s925_s30  ;;  %s1056_s20 = smov %s833_s21 }
 0x2c0   : > { %s1057_s21 = smov %s1059_s25  ;;  %18 = sbr.rel (!%p16_p10) target bundleno = 4 (0x4), region = 88 }
 0x2c5   :  { %553 = vsyncpa [#allocation9], 1 }
 0x2c6   :  { %555 = vsyncpa [#allocation9 + $0x1], 1 }

</bundles_post_ra>
